<compile_context>
chip_gen: v7x
topology: tpu7x:2x2x1
jax: 0.10.0
libtpu: 0.0.40
codegen_flags: <defaults>
</compile_context>

<pallas_src>
import jax
import jax.numpy as jnp
from jax.experimental import pallas as pl
from jax.experimental.pallas import tpu as pltpu


def _round_up(x, m):
    return ((x + m - 1) // m) * m


def _vmem_capacity_bytes():
    try:
        info = pltpu.get_tpu_info()
        cap = getattr(info, "vmem_capacity_bytes", None)
        if cap:
            return int(cap)
    except Exception:
        pass
    return 64 * 1024 * 1024  # conservative fallback (v7x per-TC)


def _ce_loss_kernel(pred_ref, tgt_ref, out_ref):
    # pred_ref: (tile_n, C) logits in VMEM (f32 or bf16) -- unpadded class axis.
    # tgt_ref : (tile_n, 1) int32 in VMEM; -1 marks padded / invalid rows.
    # out_ref : (tile_n, 1) f32, resident across the inner grid axis (accumulator).
    ti = pl.program_id(1)

    @pl.when(ti == 0)
    def _():
        out_ref[...] = jnp.zeros_like(out_ref)

    x = pred_ref[...]                                   # native dtype tile
    tn, cw = x.shape

    # Numerically stable LSE; the shared (x - m) pass also feeds the gather.
    m = jnp.max(x, axis=1, keepdims=True)               # exact in bf16 too
    xm = (x - m).astype(jnp.float32)                    # (tn, cw) f32
    lse = jnp.log(jnp.sum(jnp.exp(xm), axis=1, keepdims=True))

    # x[row, target[row]] - m via one-hot select (no dynamic gather on TPU).
    # Targets < 0 mark padded rows; targets >= C would be silently mis-handled
    # (PyTorch would raise) -- callers must pass valid class ids.
    tgt = tgt_ref[...]                                  # (tn, 1) int32
    cls = jax.lax.broadcasted_iota(jnp.int32, (tn, cw), 1)
    picked_m = jnp.sum(jnp.where(cls == tgt, xm, 0.0), axis=1, keepdims=True)

    # Per-row NLL of log_softmax: -(x[t] - m - lse) = lse - (x[t] - m).
    valid = tgt >= 0
    row_loss = jnp.where(valid, lse - picked_m, 0.0)    # select, NOT multiply-by-0
    out_ref[...] += row_loss                            # pure VPU add per step


def ce_loss(pred, target, *, tile_rows=None, num_partials=2):
    """pred: (N, C) float logits (f32 or bf16). target: (N,) / (N,1) int.

    Returns scalar f32: sum_rows NLL(log_softmax(pred, 1), target) / N,
    matching the PyTorch CELoss module (weight=None).
    """
    pred = jnp.asarray(pred)
    if pred.dtype not in (jnp.float32, jnp.bfloat16):
        pred = pred.astype(jnp.float32)
    n, c = pred.shape
    tgt = jnp.asarray(target).reshape(-1).astype(jnp.int32)
    assert tgt.shape[0] == n, "target must have one entry per row of pred"

    bytes_per = pred.dtype.itemsize
    c_lanes = _round_up(max(c, 1), 128)                 # lane-padded VMEM width

    # ---- Row-tile sizing from the actual VMEM capacity of this generation ----
    vmem_cap = _vmem_capacity_bytes()                   # 128 MiB v5e/v6e, 64 MiB v7x
    target_buf = max(2 * 1024 * 1024, vmem_cap // 16)   # ~8 MiB v5e/v6e, ~4 MiB v7x
    # Per-row VMEM in flight: double-buffered logits, ~3x f32 temporaries
    # (x-m, exp, one-hot select), double-buffered (row,1) targets, (row,1) acc.
    per_row = 2 * c_lanes * bytes_per + 3 * c_lanes * 4 + 1536
    tile_n = target_buf // max(1, c_lanes * bytes_per)
    tile_n = min(tile_n, (vmem_cap // 2) // per_row, 8192)
    if tile_rows is not None:
        tile_n = min(tile_n, int(tile_rows))
    tile_n = max(16, (tile_n // 16) * 16)               # sublane granularity (bf16-safe)
    if tile_n >= n:
        tile_n = n                                      # single full-row block (always legal)

    tiles_real = -(-n // tile_n)

    # Partial axis (maps to the two TensorCores on v7x via "parallel").
    p = max(1, min(num_partials, tiles_real))
    if tiles_real % p != 0 and tiles_real < 8:
        p = 1                                           # don't pay >=12.5% in redundant tiles
    t_per_p = -(-tiles_real // p)
    tiles_total = p * t_per_p
    rows_pad = tiles_total * tile_n

    # Only the tiny target array gets padded (-1 => masked row). The logits are
    # consumed in place; ragged / redundant blocks are masked in-kernel.
    tgt2 = tgt.reshape(n, 1)
    if rows_pad != n:
        tgt_p = jnp.full((rows_pad, 1), -1, jnp.int32).at[:n, :].set(tgt2)
    else:
        tgt_p = tgt2

    last_block = tiles_real - 1

    def pred_map(pi, ti):
        b = jnp.minimum(pi * t_per_p + ti, last_block)  # clamp redundant tiles in-bounds
        return (b, 0)

    def tgt_map(pi, ti):
        return (pi * t_per_p + ti, 0)

    vmem_need = per_row * tile_n + (2 << 20)
    vmem_limit = int(min(vmem_cap, max(2 * vmem_need, 32 * 1024 * 1024)))

    out = pl.pallas_call(
        _ce_loss_kernel,
        out_shape=jax.ShapeDtypeStruct((p, tile_n, 1), jnp.float32),
        grid_spec=pltpu.PrefetchScalarGridSpec(
            num_scalar_prefetch=0,
            grid=(p, t_per_p),
            in_specs=[
                pl.BlockSpec((tile_n, c), pred_map),     # full class axis, no C padding
                pl.BlockSpec((tile_n, 1), tgt_map),
            ],
            out_specs=pl.BlockSpec((None, tile_n, 1), lambda pi, ti: (pi, 0, 0)),
        ),
        compiler_params=pltpu.CompilerParams(
            dimension_semantics=("parallel", "arbitrary"),
            vmem_limit_bytes=vmem_limit,
        ),
        cost_estimate=pl.CostEstimate(
            flops=5 * n * c,
            transcendentals=n * c + n,
            bytes_accessed=n * c * bytes_per + rows_pad * 4 + p * tile_n * 4,
        ),
    )(pred, tgt_p)

    # Each real row contributed exactly once (padded/redundant rows are 0).
    return jnp.sum(out) / jnp.float32(n)


def _ce_loss_ref(pred, target):
    # Pure-JAX reference (same math as the PyTorch module, weight=None).
    pred = jnp.asarray(pred).astype(jnp.float32)
    tgt = jnp.asarray(target).reshape(-1).astype(jnp.int32)
    logp = jax.nn.log_softmax(pred, axis=1)
    picked = jnp.take_along_axis(logp, tgt[:, None], axis=1)[:, 0]
    return -jnp.sum(picked) / pred.shape[0]


if __name__ == "__main__":
    key = jax.random.PRNGKey(0)
    k1, k2 = jax.random.split(key)

    # Small shape matching the module's usage: batch=8, num_classes=32.
    N, C = 8, 32
    pred = jax.random.normal(k1, (N, C), dtype=jnp.float32)
    target = jax.random.randint(k2, (N, 1), 0, C, dtype=jnp.int32)

    loss = jax.block_until_ready(ce_loss(pred, target))
    ref = jax.block_until_ready(_ce_loss_ref(pred, target))
    assert jnp.allclose(loss, ref, rtol=1e-5, atol=1e-5), (loss, ref)

    # Exercise the tiled path: ragged batch, non-128 class count, 2 partials,
    # ragged last block masked via -1 targets (no HBM-side logit padding).
    N2, C2 = 100, 200
    pred2 = jax.random.normal(k1, (N2, C2), dtype=jnp.float32)
    target2 = jax.random.randint(k2, (N2,), 0, C2, dtype=jnp.int32)
    loss2 = jax.block_until_ready(ce_loss(pred2, target2, tile_rows=32))
    ref2 = jax.block_until_ready(_ce_loss_ref(pred2, target2))
    assert jnp.allclose(loss2, ref2, rtol=1e-4, atol=1e-4), (loss2, ref2)

    # bf16 logits at the boundary (kernel keeps bf16 for max/sub, f32 for LSE).
    pred2_bf = pred2.astype(jnp.bfloat16)
    loss3 = jax.block_until_ready(ce_loss(pred2_bf, target2, tile_rows=32))
    ref3 = jax.block_until_ready(_ce_loss_ref(pred2_bf.astype(jnp.float32), target2))
    assert jnp.allclose(loss3, ref3, rtol=1e-2, atol=1e-2), (loss3, ref3)

    # Auto tile-size path on a slightly larger ragged batch.
    N3, C3 = 300, 160
    pred3 = jax.random.normal(k1, (N3, C3), dtype=jnp.float32)
    target3 = jax.random.randint(k2, (N3,), 0, C3, dtype=jnp.int32)
    loss4 = jax.block_until_ready(ce_loss(pred3, target3))
    ref4 = jax.block_until_ready(_ce_loss_ref(pred3, target3))
    assert jnp.allclose(loss4, ref4, rtol=1e-4, atol=1e-4), (loss4, ref4)

    print("KERNEL_OK")
</pallas_src>

<mosaic_0001>
module attributes {stable_mosaic.version = 11 : i64} {
  func.func @_ce_loss_kernel(%arg0: i32, %arg1: i32, %arg2: memref<8x32xf32, #tpu.memory_space<vmem>>, %arg3: memref<8x1xi32, #tpu.memory_space<vmem>>, %arg4: memref<1x8x1xf32, #tpu.memory_space<vmem>>) attributes {dimension_semantics = [#tpu.dimension_semantics<parallel>, #tpu.dimension_semantics<arbitrary>], iteration_bounds = array<i64: 1, 1>, scalar_prefetch = 0 : i64, scratch_operands = 0 : i64, tpu.core_type = #tpu.core_type<tc>, window_params = [{transform_indices = @transform_0, window_bounds = array<i64: 8, 32>}, {transform_indices = @transform_1, window_bounds = array<i64: 8, 1>}, {transform_indices = @transform_2, window_bounds = array<i64: 1, 8, 1>}]} {
    %c0_i32 = arith.constant 0 : i32
    %0 = arith.cmpi eq, %arg1, %c0_i32 : i32
    %1 = arith.extui %0 : i1 to i32
    %c0_i32_0 = arith.constant 0 : i32
    %2 = arith.cmpi ne, %1, %c0_i32_0 : i32
    scf.if %2 {
      %cst_15 = arith.constant 0.000000e+00 : f32
      %31 = vector.broadcast %cst_15 : f32 to vector<8x1xf32>
      %c0_16 = arith.constant 0 : index
      %c0_17 = arith.constant 0 : index
      %c0_18 = arith.constant 0 : index
      %32 = vector.load %arg4[%c0_16, %c0_17, %c0_18] : memref<1x8x1xf32, #tpu.memory_space<vmem>>, vector<1x8x1xf32>
      %33 = vector.shape_cast %32 : vector<1x8x1xf32> to vector<8x1xf32>
      %34 = vector.shape_cast %31 : vector<8x1xf32> to vector<1x8x1xf32>
      tpu.vector_store %arg4[%c0_16, %c0_17, %c0_18], %34 {strides = array<i32>} : memref<1x8x1xf32, #tpu.memory_space<vmem>>, vector<1x8x1xf32>,
    } else {
    }
    %c0 = arith.constant 0 : index
    %c0_1 = arith.constant 0 : index
    %3 = vector.load %arg2[%c0, %c0_1] : memref<8x32xf32, #tpu.memory_space<vmem>>, vector<8x32xf32>
    %cst = arith.constant dense<0xFF800000> : vector<8xf32>
    %4 = vector.multi_reduction <maximumf>, %3, %cst [1] : vector<8x32xf32> to vector<8xf32>
    %5 = vector.shape_cast %4 : vector<8xf32> to vector<8x1xf32>
    %6 = vector.broadcast %5 : vector<8x1xf32> to vector<8x32xf32>
    %7 = arith.subf %3, %6 : vector<8x32xf32>
    %8 = math.exp %7 : vector<8x32xf32>
    %cst_2 = arith.constant dense<0.000000e+00> : vector<8xf32>
    %9 = vector.multi_reduction <add>, %8, %cst_2 [1] : vector<8x32xf32> to vector<8xf32>
    %10 = vector.shape_cast %9 : vector<8xf32> to vector<8x1xf32>
    %11 = math.log %10 : vector<8x1xf32>
    %c0_3 = arith.constant 0 : index
    %c0_4 = arith.constant 0 : index
    %12 = vector.load %arg3[%c0_3, %c0_4] : memref<8x1xi32, #tpu.memory_space<vmem>>, vector<8x1xi32>
    %13 = tpu.iota {dimensions = array<i32: 1>} : vector<8x32xi32>
    %14 = vector.broadcast %12 : vector<8x1xi32> to vector<8x32xi32>
    %15 = arith.cmpi eq, %13, %14 : vector<8x32xi32>
    %cst_5 = arith.constant 0.000000e+00 : f32
    %16 = vector.broadcast %cst_5 : f32 to vector<8x32xf32>
    %17 = arith.select %15, %7, %16 : vector<8x32xi1>, vector<8x32xf32>
    %cst_6 = arith.constant dense<0.000000e+00> : vector<8xf32>
    %18 = vector.multi_reduction <add>, %17, %cst_6 [1] : vector<8x32xf32> to vector<8xf32>
    %19 = vector.shape_cast %18 : vector<8xf32> to vector<8x1xf32>
    %c0_i32_7 = arith.constant 0 : i32
    %20 = vector.broadcast %c0_i32_7 : i32 to vector<8x1xi32>
    %21 = arith.cmpi sge, %12, %20 : vector<8x1xi32>
    %22 = arith.subf %11, %19 : vector<8x1xf32>
    %cst_8 = arith.constant 0.000000e+00 : f32
    %23 = vector.broadcast %cst_8 : f32 to vector<8x1xf32>
    %24 = arith.select %21, %22, %23 : vector<8x1xi1>, vector<8x1xf32>
    %c0_9 = arith.constant 0 : index
    %c0_10 = arith.constant 0 : index
    %c0_11 = arith.constant 0 : index
    %25 = vector.load %arg4[%c0_9, %c0_10, %c0_11] : memref<1x8x1xf32, #tpu.memory_space<vmem>>, vector<1x8x1xf32>
    %26 = vector.shape_cast %25 : vector<1x8x1xf32> to vector<8x1xf32>
    %27 = arith.addf %26, %24 : vector<8x1xf32>
    %c0_12 = arith.constant 0 : index
    %c0_13 = arith.constant 0 : index
    %c0_14 = arith.constant 0 : index
    %28 = vector.load %arg4[%c0_12, %c0_13, %c0_14] : memref<1x8x1xf32, #tpu.memory_space<vmem>>, vector<1x8x1xf32>
    %29 = vector.shape_cast %28 : vector<1x8x1xf32> to vector<8x1xf32>
    %30 = vector.shape_cast %27 : vector<8x1xf32> to vector<1x8x1xf32>
    tpu.vector_store %arg4[%c0_12, %c0_13, %c0_14], %30 {strides = array<i32>} : memref<1x8x1xf32, #tpu.memory_space<vmem>>, vector<1x8x1xf32>,
    return
  }
  func.func @transform_0(%arg0: i32, %arg1: i32) -> (i32, i32) {
    %c1_i32 = arith.constant 1 : i32
    %0 = arith.muli %arg0, %c1_i32 : i32
    %1 = arith.addi %0, %arg1 : i32
    %c0_i32 = arith.constant 0 : i32
    %2 = arith.minsi %1, %c0_i32 : i32
    %c0_i32_0 = arith.constant 0 : i32
    %c0_i32_1 = arith.constant 0 : i32
    return %2, %c0_i32_0 : i32, i32
  }
  func.func @transform_1(%arg0: i32, %arg1: i32) -> (i32, i32) {
    %c1_i32 = arith.constant 1 : i32
    %0 = arith.muli %arg0, %c1_i32 : i32
    %1 = arith.addi %0, %arg1 : i32
    %c0_i32 = arith.constant 0 : i32
    %c0_i32_0 = arith.constant 0 : i32
    return %1, %c0_i32 : i32, i32
  }
  func.func @transform_2(%arg0: i32, %arg1: i32) -> (i32, i32, i32) {
    %c0_i32 = arith.constant 0 : i32
    %c0_i32_0 = arith.constant 0 : i32
    %c0_i32_1 = arith.constant 0 : i32
    return %arg0, %c0_i32, %c0_i32_0 : i32, i32, i32
  }
}

</mosaic_0001>

<bundles_post_ra>
// kernel: tpu_custom_call.1
= control target key start
LH: loop header
LB: loop body
LE: loop exit
PB: predicated region body
PF: predicated region fallthrough
CT: control target
= control target key end

     0   :  { %vm62_vm0 = vcmask 261120   ;;  %v115_v1 = vmov 0   ;;  %v75_v7 = vlaneseq  ;;  %vm59_vm2 = vcmask 7168   ;;  %s150_s0 = inlined_call_operand.vmem [shape: f32[8,32], index: 0, kind: input, shape index: {}]   ;;  %s151_s1 = inlined_call_operand.vmem [shape: s32[8,1], index: 1, kind: input, shape index: {}]   ;;  %s152_s2 = inlined_call_operand.vmem [shape: f32[1,8,1], index: 2, kind: output, shape index: {}]  }
   0x1   :  { %v61_v0 = vld [vmem:[%s150_s0] sm:$0xff]  ;;  %110 = vset.pattern.permute.xlu0 %v115_v1  ;;  %v116_v14 = vmov 0.0  }
   0x2   :  { %v63_v2 = vsel %vm62_vm0, %v61_v0, -inf  ;;  %v74_v3 = vld [vmem:[%s151_s1] sm:$0xff]  ;;  %v76_v8 = vand.u32 127, %v75_v7  ;;  %60 = vst.msk [vmem:[%s152_s2] sm:$0xff] %vm59_vm2, %v116_v14 }
   0x3   :  { %64 = vmax.xlane.f32.xlu0 %v63_v2  ;;  %vm85_vm3 = vcmp.ge.s32.totalorder %v74_v3, 0 }
   0x9   :  { %v88_v19 = vld [vmem:[%s152_s2] sm:$0xff] }
  0x19   :  { %78 = vperm.xlu0 %110, %v74_v3  }
  0x90   :  { %v65_v4 = vpop.xlane.xlu0 %64 }
  0x91   :  { %v66_v5 = vsub.f32 %v61_v0, %v65_v4 }
  0x93   :  { %v67_v6 = vmul.f32 1.442695, %v66_v5 }
  0x95   :  { %111 = vpow2.f32 %v67_v6 }
  0x98   :  { %v79_v9 = vpop.permute.xlu0 %78 }
  0x99   :  { %vm80_vm1 = vcmp.eq.s32.totalorder %v76_v8, %v79_v9 }
  0x9a   :  { %v81_v12 = vsel %vm80_vm1, %v66_v5, 0.0 }
  0x9b   :  { %v82_v13 = vsel %vm62_vm0, %v81_v12, 0.0 }
  0x9f   :  { %v112_v10 = vpop.eup %111 }
  0xa0   :  { %v69_v11 = vsel %vm62_vm0, %v112_v10, 0.0 }
  0xa1   :  { %70 = vadd.xlane.f32.xlu1 %v69_v11 }
  0xa5   :  { %83 = vadd.xlane.f32.xlu1 %v82_v13 }
 0x12e   :  { %v71_v15 = vpop.xlane.xlu1 %70 }
 0x12f   :  { %113 = vlog2.f32 %v71_v15 }
 0x132   :  { %v84_v18 = vpop.xlane.xlu1 %83 }
 0x139   :  { %v114_v16 = vpop.eup %113 }
 0x13a   :  { %v73_v17 = vmul.f32 0.6931472, %v114_v16 }
 0x13c   :  { %v86_v20 = vsub.f32 %v73_v17, %v84_v18 }
 0x13e   :  { %v87_v21 = vsel %vm85_vm3, %v86_v20, 0.0 }
 0x13f   :  { %v89_v22 = vadd.f32 %v88_v19, %v87_v21 }
 0x141   :  { %91 = vst.msk [vmem:[%s152_s2] sm:$0xff] %vm59_vm2, %v89_v22 }

</bundles_post_ra>
